<compile_context>
chip_gen: v7x
topology: tpu7x:2x2x1
jax: 0.10.0
libtpu: 0.0.40
codegen_flags: <defaults>
</compile_context>

<pallas_src>
import jax
import jax.numpy as jnp
from jax.experimental import pallas as pl
from jax.experimental.pallas import tpu as pltpu

D_MODEL = 32
HIDDEN = 128


def _elu(v, exp_dtype):
    # ELU, alpha=1.0.  The exp runs in `exp_dtype` (bf16 by default; on v5e
    # Mosaic simply inserts casts).  NOTE: exp(v) is also evaluated on the
    # positive branch and may overflow to +inf for large pre-activations;
    # this is benign under jnp.where (a lane select, not arithmetic) -- do
    # not refactor into a masked-arithmetic form.
    e = jnp.exp(v.astype(exp_dtype)).astype(jnp.float32)
    return jnp.where(v > 0, v, e - 1.0)


def adversary_kernel(
    x_ref, z_ref, mask_ref,
    wi_ref, bi_ref,
    wd0_ref, bd0_ref, wn0_ref, bn0_ref,
    wd1_ref, bd1_ref, wn1_ref, bn1_ref,
    wo_ref, bo_ref,
    o_ref,
):
    cdt = wi_ref.dtype                      # MXU operand dtype (bf16 default)
    z = z_ref[...].astype(jnp.float32)      # f32 copy for the 0.5*z^2 epilogue

    # linear_i(cat(x, z)): concat on the lane axis in VMEM -> single K=64 dot.
    xz = jnp.concatenate(
        [x_ref[...].astype(cdt), z_ref[...].astype(cdt)], axis=-1)
    net = (jnp.dot(xz, wi_ref[...], preferred_element_type=jnp.float32)
           + bi_ref[...])
    # dropout1: identity (eval mode)

    # Two residual ELU blocks (unrolled, matching the Python for-loop).
    for wd_ref, bd_ref, wn_ref, bn_ref in (
        (wd0_ref, bd0_ref, wn0_ref, bn0_ref),
        (wd1_ref, bd1_ref, wn1_ref, bn1_ref),
    ):
        # dnet only feeds the next matmul: fold the bias add and the operand
        # cast into one expression and carry it in the compute dtype (halves
        # the VMEM ld/st bytes of this (tile,128) intermediate).
        dnet = (jnp.dot(net.astype(cdt), wd_ref[...],
                        preferred_element_type=jnp.float32)
                + bd_ref[...]).astype(cdt)
        net = net + (jnp.dot(dnet, wn_ref[...],
                             preferred_element_type=jnp.float32)
                     + bn_ref[...])
        net = _elu(net, cdt)

    out = (jnp.dot(net.astype(cdt), wo_ref[...],
                   preferred_element_type=jnp.float32)
           + bo_ref[...])
    # dropout2: identity (eval mode).  Epilogue fused into the single store:
    # + 0.5 * z^2, then padding mask (mask = 1 - padding, precomputed).
    o_ref[...] = ((out + 0.5 * (z * z)) * mask_ref[...]).astype(o_ref.dtype)


def _choose_tile(T, token_tile, granule=8):
    """Pick (tile, T_padded).

    Prefers a PAD-FREE tile: the largest multiple of `granule` that divides T
    and is <= token_tile, preferring an even block count (keeps v7x's two
    TensorCores balanced under dimension_semantics=("parallel",)).  Falls back
    to padding only when T has no usable divisor; the fallback keeps padding
    to at most ~granule rows per block.
    """
    token_tile = max(granule, (token_tile // granule) * granule)
    if T >= granule:
        cap = min(token_tile, max(granule, (T // granule) * granule))
    else:
        cap = granule
    if T % granule == 0:
        divs = [t for t in range(granule, cap + 1, granule) if T % t == 0]
        # Reject absurdly small pad-free tiles (tiny tiles waste ~0.35 us/step
        # of grid overhead and under-fill the MXU).
        divs = [t for t in divs if t * 4 >= cap or t >= T]
        if divs:
            even = [t for t in divs if (T // t) % 2 == 0]
            if even and 2 * even[-1] >= divs[-1]:
                return even[-1], T
            return divs[-1], T
    # Fallback (rare): pad.  n_blocks near the cap, per-block rounded up to a
    # granule, so total padding is < n_blocks * granule rows.
    n_blocks = -(-T // token_tile)
    per = -(-T // n_blocks)
    tile = -(-per // granule) * granule
    return tile, n_blocks * tile


def adversary_forward(x, z, padding, params, *, token_tile=2048,
                      matmul_dtype=jnp.bfloat16):
    """x, z: [B, S, d_model]; padding: [B, S] (0/1). Returns [B, S, d_model] f32.

    matmul_dtype=jnp.float32 selects an f32-operand path (MXU operands and the
    ELU exp stay f32) when closer parity with the PyTorch f32 forward matters.
    """
    B, S, d_model = x.shape
    T = B * S

    # bf16 inputs use 16-row sublane packing; keep tiles aligned to it.
    granule = 8 if (x.dtype == jnp.float32 and z.dtype == jnp.float32) else 16
    tile, T_pad = _choose_tile(T, token_tile, granule)
    n_blocks = T_pad // tile

    # Inputs are NOT upcast here (that would be an extra un-hidden HBM pass if
    # the caller hands us bf16 activations); the kernel casts in VMEM.
    x2 = x.reshape(T, d_model)
    z2 = z.reshape(T, d_model)
    mask2 = 1.0 - padding.reshape(T, 1).astype(jnp.float32)

    if T_pad != T:
        # Rare fallback (T has no usable multiple-of-`granule` divisor).  The
        # padded rows carry mask == 0, so they are zeroed on store and sliced
        # off below.
        pad = T_pad - T
        x2 = jnp.pad(x2, ((0, pad), (0, 0)))
        z2 = jnp.pad(z2, ((0, pad), (0, 0)))
        mask2 = jnp.pad(mask2, ((0, pad), (0, 0)))

    (wi, bi, wd0, bd0, wn0, bn0, wd1, bd1, wn1, bn1, wo, bo) = params

    wcast = lambda w: w.astype(matmul_dtype)   # MXU operands
    f32 = lambda b: b.astype(jnp.float32)      # post-accumulation adds
    param_args = (
        wcast(wi), f32(bi),
        wcast(wd0), f32(bd0), wcast(wn0), f32(bn0),
        wcast(wd1), f32(bd1), wcast(wn1), f32(bn1),
        wcast(wo), f32(bo),
    )

    tok_spec = pl.BlockSpec((tile, d_model), lambda i: (i, 0))
    # NOTE: the (tile, 1) f32 mask block lane-pads to 128 in VMEM (same VMEM
    # footprint as x itself); kept f32 for lowering safety with lane-1 blocks
    # and accounted for in the token_tile default / vmem_limit below.
    mask_spec = pl.BlockSpec((tile, 1), lambda i: (i, 0))

    def full_spec(arr):
        # Constant index map -> fetched into VMEM once, reused every grid step.
        return pl.BlockSpec(arr.shape, lambda i: (0, 0))

    grid_spec = pltpu.PrefetchScalarGridSpec(
        num_scalar_prefetch=0,
        grid=(n_blocks,),
        in_specs=[tok_spec, tok_spec, mask_spec]
                 + [full_spec(a) for a in param_args],
        out_specs=tok_spec,
    )

    flops = 2 * T_pad * (2 * d_model * HIDDEN
                         + 4 * HIDDEN * HIDDEN
                         + HIDDEN * d_model)
    transcendentals = 2 * T_pad * HIDDEN
    weight_bytes = sum(int(a.size) * a.dtype.itemsize for a in param_args)
    io_bytes = (T_pad * d_model * (x2.dtype.itemsize + z2.dtype.itemsize)
                + T_pad * 4                    # mask
                + T_pad * d_model * 4          # output
                + weight_bytes)
    cost = pl.CostEstimate(flops=int(flops),
                           transcendentals=int(transcendentals),
                           bytes_accessed=int(io_bytes))

    out2 = pl.pallas_call(
        adversary_kernel,
        out_shape=jax.ShapeDtypeStruct((T_pad, d_model), jnp.float32),
        grid_spec=grid_spec,
        compiler_params=pltpu.CompilerParams(
            dimension_semantics=("parallel",),
            # VMEM budget at tile=2048: ~8 MiB of double-buffered I/O blocks
            # (x/z/out/mask all lane-pad to 128) + a few (tile,128)
            # intermediates.  32 MiB keeps headroom on every generation
            # (v7x physical VMEM = 64 MiB per TensorCore).
            vmem_limit_bytes=32 * 1024 * 1024),
        cost_estimate=cost,
    )(x2, z2, mask2, *param_args)

    if T_pad != T:
        out2 = out2[:T]
    return out2.reshape(B, S, d_model)


def init_params(key, d_model=D_MODEL, hidden=HIDDEN):
    """Deterministic synthetic parameters (PyTorch-style uniform fan-in init)."""
    keys = jax.random.split(key, 12)

    def linear(kw, kb, fan_in, fan_out):
        bound = 1.0 / jnp.sqrt(fan_in)
        # stored transposed: [in, out]
        w = jax.random.uniform(kw, (fan_in, fan_out), jnp.float32, -bound, bound)
        b = jax.random.uniform(kb, (1, fan_out), jnp.float32, -bound, bound)
        return w, b

    wi, bi = linear(keys[0], keys[1], 2 * d_model, hidden)   # linear_i (un-split)
    wd0, bd0 = linear(keys[2], keys[3], hidden, hidden)
    wn0, bn0 = linear(keys[4], keys[5], hidden, hidden)
    wd1, bd1 = linear(keys[6], keys[7], hidden, hidden)
    wn1, bn1 = linear(keys[8], keys[9], hidden, hidden)
    wo, bo = linear(keys[10], keys[11], hidden, d_model)     # linear_o

    return (wi, bi, wd0, bd0, wn0, bn0, wd1, bd1, wn1, bn1, wo, bo)


def adversary_reference(x, z, padding, params, *, matmul_dtype=jnp.float32):
    """Pure-JAX reference mirroring the PyTorch forward (eval mode).

    matmul_dtype=jnp.bfloat16 reproduces the kernel's default precision
    (bf16 MXU operands / f32 accumulation, bf16 ELU exp) for a tight check."""
    (wi, bi, wd0, bd0, wn0, bn0, wd1, bd1, wn1, bn1, wo, bo) = params

    def mm(a, w):
        return jnp.dot(a.astype(matmul_dtype), w.astype(matmul_dtype),
                       preferred_element_type=jnp.float32)

    net = mm(jnp.concatenate([x, z], axis=-1), wi) + bi
    for wd, bd, wn, bn in ((wd0, bd0, wn0, bn0), (wd1, bd1, wn1, bn1)):
        dnet = mm(net, wd) + bd
        net = net + (mm(dnet, wn) + bn)
        e = jnp.exp(net.astype(matmul_dtype)).astype(jnp.float32)
        net = jnp.where(net > 0, net, e - 1.0)
    net = mm(net, wo) + bo
    net = net + 0.5 * jnp.square(z.astype(jnp.float32))
    net = net * (1.0 - padding.astype(jnp.float32)[:, :, None])
    return net


if __name__ == "__main__":
    key = jax.random.PRNGKey(0)
    k_param, k_x, k_z, k_pad = jax.random.split(key, 4)

    B, S = 2, 8
    params = init_params(k_param)

    x = jax.random.normal(k_x, (B, S, D_MODEL), jnp.float32)
    z = jax.random.normal(k_z, (B, S, D_MODEL), jnp.float32)
    padding = (jax.random.uniform(k_pad, (B, S)) > 0.7).astype(jnp.int32)

    # Default (bf16-operand) kernel.
    out = adversary_forward(x, z, padding, params)
    out = jax.block_until_ready(out)
    assert out.shape == (B, S, D_MODEL)
    assert bool(jnp.all(jnp.isfinite(out)))

    # Tight check against a precision-matched (bf16) reference.
    ref_matched = adversary_reference(x, z, padding, params,
                                      matmul_dtype=jnp.bfloat16)
    assert jnp.allclose(out, ref_matched, atol=5e-3, rtol=5e-3), \
        "mismatch vs bf16-matched reference"

    # Loose sanity check against the full-f32 reference.
    ref_f32 = adversary_reference(x, z, padding, params,
                                  matmul_dtype=jnp.float32)
    assert jnp.allclose(out, ref_f32, atol=1e-1, rtol=1e-1), \
        "mismatch vs f32 reference"

    # f32-operand path (offered for callers needing closer torch parity).
    out_f32 = adversary_forward(x, z, padding, params,
                                matmul_dtype=jnp.float32)
    out_f32 = jax.block_until_ready(out_f32)
    assert jnp.allclose(out_f32, ref_f32, atol=5e-2, rtol=5e-2), \
        "mismatch vs f32 reference (f32 kernel path)"

    print("KERNEL_OK")
</pallas_src>

<mosaic_0001>
module attributes {stable_mosaic.version = 11 : i64} {
  func.func @adversary_kernel(%arg0: i32, %arg1: memref<8x32xf32, #tpu.memory_space<vmem>>, %arg2: memref<8x32xf32, #tpu.memory_space<vmem>>, %arg3: memref<8x1xf32, #tpu.memory_space<vmem>>, %arg4: memref<64x128xbf16, #tpu.memory_space<vmem>>, %arg5: memref<1x128xf32, #tpu.memory_space<vmem>>, %arg6: memref<128x128xbf16, #tpu.memory_space<vmem>>, %arg7: memref<1x128xf32, #tpu.memory_space<vmem>>, %arg8: memref<128x128xbf16, #tpu.memory_space<vmem>>, %arg9: memref<1x128xf32, #tpu.memory_space<vmem>>, %arg10: memref<128x128xbf16, #tpu.memory_space<vmem>>, %arg11: memref<1x128xf32, #tpu.memory_space<vmem>>, %arg12: memref<128x128xbf16, #tpu.memory_space<vmem>>, %arg13: memref<1x128xf32, #tpu.memory_space<vmem>>, %arg14: memref<128x32xbf16, #tpu.memory_space<vmem>>, %arg15: memref<1x32xf32, #tpu.memory_space<vmem>>, %arg16: memref<8x32xf32, #tpu.memory_space<vmem>>) attributes {dimension_semantics = [#tpu.dimension_semantics<parallel>], iteration_bounds = array<i64: 2>, scalar_prefetch = 0 : i64, scratch_operands = 0 : i64, tpu.core_type = #tpu.core_type<tc>, window_params = [{transform_indices = @transform_0, window_bounds = array<i64: 8, 32>}, {transform_indices = @transform_1, window_bounds = array<i64: 8, 32>}, {transform_indices = @transform_2, window_bounds = array<i64: 8, 1>}, {pipeline_mode = #tpu.pipeline_mode<synchronous>, transform_indices = @transform_3, window_bounds = array<i64: 64, 128>}, {pipeline_mode = #tpu.pipeline_mode<synchronous>, transform_indices = @transform_4, window_bounds = array<i64: 1, 128>}, {pipeline_mode = #tpu.pipeline_mode<synchronous>, transform_indices = @transform_5, window_bounds = array<i64: 128, 128>}, {pipeline_mode = #tpu.pipeline_mode<synchronous>, transform_indices = @transform_6, window_bounds = array<i64: 1, 128>}, {pipeline_mode = #tpu.pipeline_mode<synchronous>, transform_indices = @transform_7, window_bounds = array<i64: 128, 128>}, {pipeline_mode = #tpu.pipeline_mode<synchronous>, transform_indices = @transform_8, window_bounds = array<i64: 1, 128>}, {pipeline_mode = #tpu.pipeline_mode<synchronous>, transform_indices = @transform_9, window_bounds = array<i64: 128, 128>}, {pipeline_mode = #tpu.pipeline_mode<synchronous>, transform_indices = @transform_10, window_bounds = array<i64: 1, 128>}, {pipeline_mode = #tpu.pipeline_mode<synchronous>, transform_indices = @transform_11, window_bounds = array<i64: 128, 128>}, {pipeline_mode = #tpu.pipeline_mode<synchronous>, transform_indices = @transform_12, window_bounds = array<i64: 1, 128>}, {pipeline_mode = #tpu.pipeline_mode<synchronous>, transform_indices = @transform_13, window_bounds = array<i64: 128, 32>}, {pipeline_mode = #tpu.pipeline_mode<synchronous>, transform_indices = @transform_14, window_bounds = array<i64: 1, 32>}, {transform_indices = @transform_15, window_bounds = array<i64: 8, 32>}]} {
    %c0 = arith.constant 0 : index
    %c0_0 = arith.constant 0 : index
    %0 = vector.load %arg2[%c0, %c0_0] : memref<8x32xf32, #tpu.memory_space<vmem>>, vector<8x32xf32>
    %c0_1 = arith.constant 0 : index
    %c0_2 = arith.constant 0 : index
    %1 = vector.load %arg1[%c0_1, %c0_2] : memref<8x32xf32, #tpu.memory_space<vmem>>, vector<8x32xf32>
    %2 = arith.truncf %1 : vector<8x32xf32> to vector<8x32xbf16>
    %c0_3 = arith.constant 0 : index
    %c0_4 = arith.constant 0 : index
    %3 = vector.load %arg2[%c0_3, %c0_4] : memref<8x32xf32, #tpu.memory_space<vmem>>, vector<8x32xf32>
    %4 = arith.truncf %3 : vector<8x32xf32> to vector<8x32xbf16>
    %5 = tpu.concatenate %2, %4 in 1 : vector<8x32xbf16>, vector<8x32xbf16> -> vector<8x64xbf16>
    %c0_5 = arith.constant 0 : index
    %c0_6 = arith.constant 0 : index
    %6 = vector.load %arg4[%c0_5, %c0_6] : memref<64x128xbf16, #tpu.memory_space<vmem>>, vector<64x128xbf16>
    %cst = arith.constant dense<0.000000e+00> : vector<8x128xf32>
    %7 = tpu.matmul %5, %6, %cst {dimension_numbers = #tpu.dot_dimension_numbers<[1], [0], [0], [1], [0, 0, 1, 1], [], []>} : vector<8x64xbf16>, vector<64x128xbf16>, vector<8x128xf32> -> vector<8x128xf32>
    %c0_7 = arith.constant 0 : index
    %c0_8 = arith.constant 0 : index
    %8 = vector.load %arg5[%c0_7, %c0_8] : memref<1x128xf32, #tpu.memory_space<vmem>>, vector<1x128xf32>
    %9 = vector.broadcast %8 : vector<1x128xf32> to vector<8x128xf32>
    %10 = arith.addf %7, %9 : vector<8x128xf32>
    %11 = arith.truncf %10 : vector<8x128xf32> to vector<8x128xbf16>
    %c0_9 = arith.constant 0 : index
    %c0_10 = arith.constant 0 : index
    %12 = vector.load %arg6[%c0_9, %c0_10] : memref<128x128xbf16, #tpu.memory_space<vmem>>, vector<128x128xbf16>
    %cst_11 = arith.constant dense<0.000000e+00> : vector<8x128xf32>
    %13 = tpu.matmul %11, %12, %cst_11 {dimension_numbers = #tpu.dot_dimension_numbers<[1], [0], [0], [1], [0, 0, 1, 1], [], []>} : vector<8x128xbf16>, vector<128x128xbf16>, vector<8x128xf32> -> vector<8x128xf32>
    %c0_12 = arith.constant 0 : index
    %c0_13 = arith.constant 0 : index
    %14 = vector.load %arg7[%c0_12, %c0_13] : memref<1x128xf32, #tpu.memory_space<vmem>>, vector<1x128xf32>
    %15 = vector.broadcast %14 : vector<1x128xf32> to vector<8x128xf32>
    %16 = arith.addf %13, %15 : vector<8x128xf32>
    %17 = arith.truncf %16 : vector<8x128xf32> to vector<8x128xbf16>
    %c0_14 = arith.constant 0 : index
    %c0_15 = arith.constant 0 : index
    %18 = vector.load %arg8[%c0_14, %c0_15] : memref<128x128xbf16, #tpu.memory_space<vmem>>, vector<128x128xbf16>
    %cst_16 = arith.constant dense<0.000000e+00> : vector<8x128xf32>
    %19 = tpu.matmul %17, %18, %cst_16 {dimension_numbers = #tpu.dot_dimension_numbers<[1], [0], [0], [1], [0, 0, 1, 1], [], []>} : vector<8x128xbf16>, vector<128x128xbf16>, vector<8x128xf32> -> vector<8x128xf32>
    %c0_17 = arith.constant 0 : index
    %c0_18 = arith.constant 0 : index
    %20 = vector.load %arg9[%c0_17, %c0_18] : memref<1x128xf32, #tpu.memory_space<vmem>>, vector<1x128xf32>
    %21 = vector.broadcast %20 : vector<1x128xf32> to vector<8x128xf32>
    %22 = arith.addf %19, %21 : vector<8x128xf32>
    %23 = arith.addf %10, %22 : vector<8x128xf32>
    %24 = arith.truncf %23 : vector<8x128xf32> to vector<8x128xbf16>
    %25 = math.exp %24 : vector<8x128xbf16>
    %26 = arith.extf %25 : vector<8x128xbf16> to vector<8x128xf32>
    %cst_19 = arith.constant 0.000000e+00 : f32
    %27 = vector.broadcast %cst_19 : f32 to vector<8x128xf32>
    %28 = arith.cmpf ogt, %23, %27 : vector<8x128xf32>
    %cst_20 = arith.constant 1.000000e+00 : f32
    %29 = vector.broadcast %cst_20 : f32 to vector<8x128xf32>
    %30 = arith.subf %26, %29 : vector<8x128xf32>
    %31 = arith.select %28, %23, %30 : vector<8x128xi1>, vector<8x128xf32>
    %32 = arith.truncf %31 : vector<8x128xf32> to vector<8x128xbf16>
    %c0_21 = arith.constant 0 : index
    %c0_22 = arith.constant 0 : index
    %33 = vector.load %arg10[%c0_21, %c0_22] : memref<128x128xbf16, #tpu.memory_space<vmem>>, vector<128x128xbf16>
    %cst_23 = arith.constant dense<0.000000e+00> : vector<8x128xf32>
    %34 = tpu.matmul %32, %33, %cst_23 {dimension_numbers = #tpu.dot_dimension_numbers<[1], [0], [0], [1], [0, 0, 1, 1], [], []>} : vector<8x128xbf16>, vector<128x128xbf16>, vector<8x128xf32> -> vector<8x128xf32>
    %c0_24 = arith.constant 0 : index
    %c0_25 = arith.constant 0 : index
    %35 = vector.load %arg11[%c0_24, %c0_25] : memref<1x128xf32, #tpu.memory_space<vmem>>, vector<1x128xf32>
    %36 = vector.broadcast %35 : vector<1x128xf32> to vector<8x128xf32>
    %37 = arith.addf %34, %36 : vector<8x128xf32>
    %38 = arith.truncf %37 : vector<8x128xf32> to vector<8x128xbf16>
    %c0_26 = arith.constant 0 : index
    %c0_27 = arith.constant 0 : index
    %39 = vector.load %arg12[%c0_26, %c0_27] : memref<128x128xbf16, #tpu.memory_space<vmem>>, vector<128x128xbf16>
    %cst_28 = arith.constant dense<0.000000e+00> : vector<8x128xf32>
    %40 = tpu.matmul %38, %39, %cst_28 {dimension_numbers = #tpu.dot_dimension_numbers<[1], [0], [0], [1], [0, 0, 1, 1], [], []>} : vector<8x128xbf16>, vector<128x128xbf16>, vector<8x128xf32> -> vector<8x128xf32>
    %c0_29 = arith.constant 0 : index
    %c0_30 = arith.constant 0 : index
    %41 = vector.load %arg13[%c0_29, %c0_30] : memref<1x128xf32, #tpu.memory_space<vmem>>, vector<1x128xf32>
    %42 = vector.broadcast %41 : vector<1x128xf32> to vector<8x128xf32>
    %43 = arith.addf %40, %42 : vector<8x128xf32>
    %44 = arith.addf %31, %43 : vector<8x128xf32>
    %45 = arith.truncf %44 : vector<8x128xf32> to vector<8x128xbf16>
    %46 = math.exp %45 : vector<8x128xbf16>
    %47 = arith.extf %46 : vector<8x128xbf16> to vector<8x128xf32>
    %cst_31 = arith.constant 0.000000e+00 : f32
    %48 = vector.broadcast %cst_31 : f32 to vector<8x128xf32>
    %49 = arith.cmpf ogt, %44, %48 : vector<8x128xf32>
    %cst_32 = arith.constant 1.000000e+00 : f32
    %50 = vector.broadcast %cst_32 : f32 to vector<8x128xf32>
    %51 = arith.subf %47, %50 : vector<8x128xf32>
    %52 = arith.select %49, %44, %51 : vector<8x128xi1>, vector<8x128xf32>
    %53 = arith.truncf %52 : vector<8x128xf32> to vector<8x128xbf16>
    %c0_33 = arith.constant 0 : index
    %c0_34 = arith.constant 0 : index
    %54 = vector.load %arg14[%c0_33, %c0_34] : memref<128x32xbf16, #tpu.memory_space<vmem>>, vector<128x32xbf16>
    %cst_35 = arith.constant dense<0.000000e+00> : vector<8x32xf32>
    %55 = tpu.matmul %53, %54, %cst_35 {dimension_numbers = #tpu.dot_dimension_numbers<[1], [0], [0], [1], [0, 0, 1, 1], [], []>} : vector<8x128xbf16>, vector<128x32xbf16>, vector<8x32xf32> -> vector<8x32xf32>
    %c0_36 = arith.constant 0 : index
    %c0_37 = arith.constant 0 : index
    %56 = vector.load %arg15[%c0_36, %c0_37] : memref<1x32xf32, #tpu.memory_space<vmem>>, vector<1x32xf32>
    %57 = vector.broadcast %56 : vector<1x32xf32> to vector<8x32xf32>
    %58 = arith.addf %55, %57 : vector<8x32xf32>
    %59 = arith.mulf %0, %0 : vector<8x32xf32>
    %cst_38 = arith.constant 5.000000e-01 : f32
    %60 = vector.broadcast %cst_38 : f32 to vector<8x32xf32>
    %61 = arith.mulf %60, %59 : vector<8x32xf32>
    %62 = arith.addf %58, %61 : vector<8x32xf32>
    %c0_39 = arith.constant 0 : index
    %c0_40 = arith.constant 0 : index
    %63 = vector.load %arg3[%c0_39, %c0_40] : memref<8x1xf32, #tpu.memory_space<vmem>>, vector<8x1xf32>
    %64 = vector.broadcast %63 : vector<8x1xf32> to vector<8x32xf32>
    %65 = arith.mulf %62, %64 : vector<8x32xf32>
    %c0_41 = arith.constant 0 : index
    %c0_42 = arith.constant 0 : index
    %66 = vector.load %arg16[%c0_41, %c0_42] : memref<8x32xf32, #tpu.memory_space<vmem>>, vector<8x32xf32>
    tpu.vector_store %arg16[%c0_41, %c0_42], %65 {strides = array<i32>} : memref<8x32xf32, #tpu.memory_space<vmem>>, vector<8x32xf32>,
    return
  }
  func.func @transform_0(%arg0: i32) -> (i32, i32) {
    %c0_i32 = arith.constant 0 : i32
    %c0_i32_0 = arith.constant 0 : i32
    return %arg0, %c0_i32 : i32, i32
  }
  func.func @transform_1(%arg0: i32) -> (i32, i32) {
    %c0_i32 = arith.constant 0 : i32
    %c0_i32_0 = arith.constant 0 : i32
    return %arg0, %c0_i32 : i32, i32
  }
  func.func @transform_2(%arg0: i32) -> (i32, i32) {
    %c0_i32 = arith.constant 0 : i32
    %c0_i32_0 = arith.constant 0 : i32
    return %arg0, %c0_i32 : i32, i32
  }
  func.func @transform_3(%arg0: i32) -> (i32, i32) {
    %c0_i32 = arith.constant 0 : i32
    %c0_i32_0 = arith.constant 0 : i32
    %c0_i32_1 = arith.constant 0 : i32
    return %c0_i32, %c0_i32_0 : i32, i32
  }
  func.func @transform_4(%arg0: i32) -> (i32, i32) {
    %c0_i32 = arith.constant 0 : i32
    %c0_i32_0 = arith.constant 0 : i32
    %c0_i32_1 = arith.constant 0 : i32
    return %c0_i32, %c0_i32_0 : i32, i32
  }
  func.func @transform_5(%arg0: i32) -> (i32, i32) {
    %c0_i32 = arith.constant 0 : i32
    %c0_i32_0 = arith.constant 0 : i32
    %c0_i32_1 = arith.constant 0 : i32
    return %c0_i32, %c0_i32_0 : i32, i32
  }
  func.func @transform_6(%arg0: i32) -> (i32, i32) {
    %c0_i32 = arith.constant 0 : i32
    %c0_i32_0 = arith.constant 0 : i32
    %c0_i32_1 = arith.constant 0 : i32
    return %c0_i32, %c0_i32_0 : i32, i32
  }
  func.func @transform_7(%arg0: i32) -> (i32, i32) {
    %c0_i32 = arith.constant 0 : i32
    %c0_i32_0 = arith.constant 0 : i32
    %c0_i32_1 = arith.constant 0 : i32
    return %c0_i32, %c0_i32_0 : i32, i32
  }
  func.func @transform_8(%arg0: i32) -> (i32, i32) {
    %c0_i32 = arith.constant 0 : i32
    %c0_i32_0 = arith.constant 0 : i32
    %c0_i32_1 = arith.constant 0 : i32
    return %c0_i32, %c0_i32_0 : i32, i32
  }
  func.func @transform_9(%arg0: i32) -> (i32, i32) {
    %c0_i32 = arith.constant 0 : i32
    %c0_i32_0 = arith.constant 0 : i32
    %c0_i32_1 = arith.constant 0 : i32
    return %c0_i32, %c0_i32_0 : i32, i32
  }
  func.func @transform_10(%arg0: i32) -> (i32, i32) {
    %c0_i32 = arith.constant 0 : i32
    %c0_i32_0 = arith.constant 0 : i32
    %c0_i32_1 = arith.constant 0 : i32
    return %c0_i32, %c0_i32_0 : i32, i32
  }
  func.func @transform_11(%arg0: i32) -> (i32, i32) {
    %c0_i32 = arith.constant 0 : i32
    %c0_i32_0 = arith.constant 0 : i32
    %c0_i32_1 = arith.constant 0 : i32
    return %c0_i32, %c0_i32_0 : i32, i32
  }
  func.func @transform_12(%arg0: i32) -> (i32, i32) {
    %c0_i32 = arith.constant 0 : i32
    %c0_i32_0 = arith.constant 0 : i32
    %c0_i32_1 = arith.constant 0 : i32
    return %c0_i32, %c0_i32_0 : i32, i32
  }
  func.func @transform_13(%arg0: i32) -> (i32, i32) {
    %c0_i32 = arith.constant 0 : i32
    %c0_i32_0 = arith.constant 0 : i32
    %c0_i32_1 = arith.constant 0 : i32
    return %c0_i32, %c0_i32_0 : i32, i32
  }
  func.func @transform_14(%arg0: i32) -> (i32, i32) {
    %c0_i32 = arith.constant 0 : i32
    %c0_i32_0 = arith.constant 0 : i32
    %c0_i32_1 = arith.constant 0 : i32
    return %c0_i32, %c0_i32_0 : i32, i32
  }
  func.func @transform_15(%arg0: i32) -> (i32, i32) {
    %c0_i32 = arith.constant 0 : i32
    %c0_i32_0 = arith.constant 0 : i32
    return %arg0, %c0_i32 : i32, i32
  }
}

</mosaic_0001>

<bundles_post_ra>
// kernel: tpu_custom_call.1
= control target key start
LH: loop header
LB: loop body
LE: loop exit
PB: predicated region body
PF: predicated region fallthrough
CT: control target
= control target key end

     0   :  { %s2857_s0 = inlined_call_operand.hbm [shape: f32[16,32], index: 0, kind: input, shape index: {}]   ;;  %s2858_s1 = inlined_call_operand.hbm [shape: f32[16,32], index: 1, kind: input, shape index: {}]   ;;  %s2859_s2 = inlined_call_operand.vmem [shape: f32[16,1], index: 2, kind: input, shape index: {}]   ;;  %s2860_s3 = inlined_call_operand.hbm [shape: bf16[64,128], index: 3, kind: input, shape index: {}]   ;;  %s2861_s4 = inlined_call_operand.vmem [shape: f32[1,128], index: 4, kind: input, shape index: {}]   ;;  %s2862_s5 = inlined_call_operand.vmem [shape: bf16[128,128], index: 5, kind: input, shape index: {}]   ;;  %s2863_s6 = inlined_call_operand.vmem [shape: f32[1,128], index: 6, kind: input, shape index: {}]   ;;  %s2864_s7 = inlined_call_operand.hbm [shape: bf16[128,128], index: 7, kind: input, shape index: {}]   ;;  %s2865_s8 = inlined_call_operand.hbm [shape: f32[1,128], index: 8, kind: input, shape index: {}]   ;;  %s2866_s9 = inlined_call_operand.vmem [shape: bf16[128,128], index: 9, kind: input, shape index: {}]   ;;  %s2867_s10 = inlined_call_operand.hbm [shape: f32[1,128], index: 10, kind: input, shape index: {}]   ;;  %s2868_s11 = inlined_call_operand.hbm [shape: bf16[128,128], index: 11, kind: input, shape index: {}]   ;;  %s2869_s12 = inlined_call_operand.hbm [shape: f32[1,128], index: 12, kind: input, shape index: {}]   ;;  %s2870_s13 = inlined_call_operand.vmem [shape: bf16[128,32], index: 13, kind: input, shape index: {}]   ;;  %s2871_s14 = inlined_call_operand.vmem [shape: f32[1,32], index: 14, kind: input, shape index: {}]   ;;  %s2872_s15 = inlined_call_operand.hbm [shape: f32[16,32], index: 15, kind: output, shape index: {}]  }
   0x1   :  { %2881 = sst [smem:[#allocation24_spill]] %s2859_s2 }
   0x2   :  { %2882 = sst [smem:[#allocation25_spill]] %s2860_s3 }
   0x3   :  { %2883 = sst [smem:[#allocation26_spill]] %s2861_s4 }
   0x4   :  { %2884 = sst [smem:[#allocation27_spill]] %s2863_s6 }
   0x5   :  { %2885 = sst [smem:[#allocation28_spill]] %s2864_s7 }
   0x6   :  { %2886 = sst [smem:[#allocation29_spill]] %s2865_s8 }
   0x7   :  { %2887 = sst [smem:[#allocation30_spill]] %s2866_s9 }
   0x8   :  { %2888 = sst [smem:[#allocation31_spill]] %s2867_s10 }
   0x9   :  { %2889 = sst [smem:[#allocation32_spill]] %s2868_s11 }
   0xa   :  { %2890 = sst [smem:[#allocation33_spill]] %s2870_s13 }
   0xb   :  { %2891 = sst [smem:[#allocation34_spill]] %s2871_s14 }
   0xc   :  { %2892 = sst [smem:[#allocation35_spill]] %s2872_s15 }
   0xd   :  { %20 = vsyncpa [#allocation3], 0 }
   0xe   :  { %22 = vsyncpa [#allocation3 + $0x1], 0 }
   0xf   :  { %23 = vsyncpa [#allocation6], 0 }
  0x10   :  { %25 = vsyncpa [#allocation6 + $0x1], 0 }
  0x11   :  { %26 = vsyncpa [#allocation9], 0 }
  0x12   :  { %27 = vsyncpa [#allocation12], 0 }
  0x13   :  { %28 = vsyncpa [#allocation15], 0 }
  0x14   :  { %29 = vsyncpa [#allocation4], 0 }
  0x15   :  { %31 = vsyncpa [#allocation4 + $0x1], 0  ;;  %s2325_s18 = smov 0   ;;  %s2327_s19 = smov 0  }
  0x16   :  { %s2329_s20 = smov 0   ;;  %s2331_s21 = smov 0  }
  0x17 LB: > { %s2230_s22 = smov [#allocation7]   ;;  %s2346_s24 = sadd.s32 4294967295, %s2228_s21   ;;  %s2228_s21 = sphi %s2331_s21, %s2931_s21   ;;  %s2224_s20 = sphi %s2329_s20, %s2930_s20   ;;  %s2220_s19 = sphi %s2327_s19, %s2929_s19   ;;  %s2216_s18 = sphi %s2325_s18, %s2928_s18  }
  0x18   : > { %s410_s23 = sshll.u32 %s2230_s22, 4  ;;  %p1505_p0 = scmp.ge.s32.totalorder %s2228_s21, 1  ;;  %s2351_s23 = int_to_ptr.vmem [resolvable:$true] %s410_s23 }
  0x19   : > { %p2877_p1 = scmp.eq.s32.totalorder %s2346_s24, 0  ;;  %p398_p2 = scmp.lt.s32.totalorder %s2228_s21, 3 }
  0x1a   : > { %s2231_s26 = smov [#allocation8]   ;;  %s2232_s29 = smov [#allocation11]  }
  0x1b   : > { %p2353_p3 = pnand %p1505_p0, %p398_p2  ;;  %s432_s27 = sshll.u32 %s2231_s26, 4  ;;  %s2366_s27 = int_to_ptr.vmem [resolvable:$true] %s432_s27 }
  0x1c   : > { %s460_s30 = sshll.u32 %s2232_s29, 4  ;;  %s2895_s3 = sld [smem:[#allocation25_spill]]  ;;  %s2368_s30 = int_to_ptr.vmem [resolvable:$true] %s460_s30 }
  0x1d   : > { %s2893_s25 = scalar_select %p2353_p3, 1, 0 }
  0x1e   : > { %p1777_p5 = pneg %p2353_p3 }
  0x20   : > { %p2362_p6 = pnand %p1777_p5, %p2877_p1 }
  0x22   : > { %s1914_s22 = scalar_lea.hbm %s2895_s3, 512  ;;  %p2378_p8 = pneg %p2362_p6 }
  0x23   : > { %p1915_p7 = scmp.ne.s32.totalorder %s2895_s3, %s1914_s22  ;;  %p1921_p11 = scmp.lt.u32.totalorder %s1914_s22, %s2895_s3 }
  0x25   : > { %p1917_p9 = pnand %p2378_p8, %p1915_p7 }
  0x27   : > { %p1918_p10 = pneg %p1917_p9 }
  0x29   : > { %p1923_p12 = pnand %p1921_p11, %p1918_p10 }
  0x2b   : > { %1926 = shalt.err (!%p1923_p12)
}
  0x2c   : > { %s1927_s14 = scalar_lea.vmem %s2351_s23, 512  ;;  %p1935_p5 = scmp.lt.s32.totalorder %s2351_s23, %s2351_s23 }
  0x2d   : > { %p1928_p13 = scmp.ne.s32.totalorder %s2351_s23, %s1927_s14  ;;  %p1936_p4 = scmp.lt.s32.totalorder %s1927_s14, %s1927_s14 }
  0x2f   : > { %p1930_p0 = pnand %p1928_p13, %p2378_p8  ;;  %p1937_p7 = por %p1936_p4, %p1935_p5 }
  0x31   : > { %p1931_p2 = pneg %p1930_p0 }
  0x33   : > { %p1938_p9 = pnand %p1937_p7, %p1931_p2 }
  0x35   : > { %1941 = shalt.err (!%p1938_p9)
}
  0x36   : > { %s2876_s15 = smov 64   ;;  %s2234_s2 = smov 4  }
  0x37   : > { %1780 = dma.hbm_to_vmem [thread:$0]  (!%p2362_p6), %s2895_s3, 512, %s2351_s23, [#allocation6], %s2876_s15, %s2876_s15, %s2234_s2  }
  0x38   : > { %s2897_s7 = sld [smem:[#allocation28_spill]] }
  0x3e   : > { %s1942_s14 = scalar_lea.hbm %s2897_s7, 1024 }
  0x3f   : > { %p1943_p4 = scmp.ne.s32.totalorder %s2897_s7, %s1942_s14  ;;  %p1949_p12 = scmp.lt.u32.totalorder %s1942_s14, %s2897_s7 }
  0x41   : > { %p1945_p10 = pnand %p1943_p4, %p2378_p8 }
  0x43   : > { %p1946_p11 = pneg %p1945_p10 }
  0x45   : > { %p1951_p13 = pnand %p1949_p12, %p1946_p11 }
  0x47   : > { %1954 = shalt.err (!%p1951_p13)
}
  0x48   : > { %s1955_s23 = scalar_lea.vmem %s2366_s27, 1024  ;;  %p1963_p7 = scmp.lt.s32.totalorder %s2366_s27, %s2366_s27 }
  0x49   : > { %p1956_p0 = scmp.ne.s32.totalorder %s2366_s27, %s1955_s23  ;;  %p1964_p9 = scmp.lt.s32.totalorder %s1955_s23, %s1955_s23 }
  0x4b   : > { %p1958_p2 = pnand %p1956_p0, %p2378_p8  ;;  %p1965_p4 = por %p1964_p9, %p1963_p7 }
  0x4d   : > { %p1959_p5 = pneg %p1958_p2 }
  0x4f   : > { %p1966_p10 = pnand %p1965_p4, %p1959_p5 }
  0x51   : > { %1969 = shalt.err (!%p1966_p10)
}
  0x52   : > { %1783 = dma.hbm_to_vmem [thread:$0]  (!%p2362_p6), %s2897_s7, 1024, %s2366_s27, [#allocation9], %s2876_s15, %s2876_s15, %s2234_s2  }
  0x53   : > { %s2898_s10 = sld [smem:[#allocation31_spill]] }
  0x59   : > { %s1970_s16 = scalar_lea.hbm %s2898_s10, 16 }
  0x5a   : > { %p1971_p11 = scmp.ne.s32.totalorder %s2898_s10, %s1970_s16  ;;  %p1977_p0 = scmp.lt.u32.totalorder %s1970_s16, %s2898_s10 }
  0x5c   : > { %p1973_p12 = pnand %p1971_p11, %p2378_p8 }
  0x5e   : > { %p1974_p13 = pneg %p1973_p12 }
  0x60   : > { %p1979_p2 = pnand %p1977_p0, %p1974_p13 }
  0x62   : > { %1982 = shalt.err (!%p1979_p2)
}
  0x63   : > { %s1983_s27 = scalar_lea.vmem %s2368_s30, 16  ;;  %s1990_s23 = scalar_lea.vmem %s2368_s30, 32 }
  0x64   : > { %p1984_p5 = scmp.ne.s32.totalorder %s2368_s30, %s1983_s27  ;;  %p1991_p4 = scmp.lt.s32.totalorder %s2368_s30, %s2368_s30 }
  0x65   : > { %p1992_p10 = scmp.lt.s32.totalorder %s1990_s23, %s1983_s27 }
  0x66   : > { %p1986_p7 = pnand %p1984_p5, %p2378_p8 }
  0x67   : > { %p1993_p11 = por %p1992_p10, %p1991_p4 }
  0x68   : > { %p1987_p9 = pneg %p1986_p7 }
  0x6a   : > { %p1994_p12 = pnand %p1993_p11, %p1987_p9 }
  0x6c   : > { %1997 = shalt.err (!%p1994_p12)
}
  0x6d   : > { %1789 = dma.hbm_to_vmem [thread:$0]  (!%p2362_p6), %s2898_s10, 16, %s2368_s30, [#allocation12]  }
  0x6e   : > { %s2235_s9 = smov [#allocation10]   ;;  %s2236_s16 = smov [#allocation13]  }
  0x6f   : > { %s446_s13 = sshll.u32 %s2235_s9, 4  ;;  %s470_s17 = sshll.u32 %s2236_s16, 4  ;;  %s447_s13 = int_to_ptr.vmem [resolvable:$true] %s446_s13  ;;  %s471_s17 = int_to_ptr.vmem [resolvable:$true] %s470_s17 }
  0x70   : > { %s2899_s8 = sld [smem:[#allocation29_spill]] }
  0x76   : > { %s1998_s14 = scalar_lea.hbm %s2899_s8, 16 }
  0x77   : > { %p1999_p13 = scmp.ne.s32.totalorder %s2899_s8, %s1998_s14  ;;  %p2005_p5 = scmp.lt.u32.totalorder %s1998_s14, %s2899_s8 }
  0x79   : > { %p2001_p0 = pnand %p1999_p13, %p2378_p8 }
  0x7b   : > { %p2002_p2 = pneg %p2001_p0 }
  0x7d   : > { %p2007_p7 = pnand %p2005_p5, %p2002_p2 }
  0x7f   : > { %2010 = shalt.err (!%p2007_p7)
}
  0x80   : > { %s2011_s30 = scalar_lea.vmem %s447_s13, 16  ;;  %s2018_s6 = scalar_lea.vmem %s447_s13, 32 }
  0x81   : > { %p2012_p9 = scmp.ne.s32.totalorder %s447_s13, %s2011_s30  ;;  %p2019_p11 = scmp.lt.s32.totalorder %s447_s13, %s447_s13 }
  0x82   : > { %p2020_p12 = scmp.lt.s32.totalorder %s2018_s6, %s2011_s30 }
  0x83   : > { %p2014_p4 = pnand %p2012_p9, %p2378_p8 }
  0x84   : > { %p2021_p1 = por %p2020_p12, %p2019_p11 }
  0x85   : > { %p2015_p10 = pneg %p2014_p4 }
  0x87   : > { %p2022_p3 = pnand %p2021_p1, %p2015_p10 }
  0x89   : > { %2025 = shalt.err (!%p2022_p3)
}
  0x8a   : > { %1786 = dma.hbm_to_vmem [thread:$0]  (!%p2362_p6), %s2899_s8, 16, %s447_s13, [#allocation9]  }
  0x8b   : > { %s2900_s11 = sld [smem:[#allocation32_spill]] }
  0x91   : > { %s2026_s29 = scalar_lea.hbm %s2900_s11, 1024 }
  0x92   : > { %p2027_p13 = scmp.ne.s32.totalorder %s2900_s11, %s2026_s29  ;;  %p2033_p3 = scmp.lt.u32.totalorder %s2026_s29, %s2900_s11 }
  0x94   : > { %p2029_p0 = pnand %p2027_p13, %p2378_p8 }
  0x96   : > { %p2030_p1 = pneg %p2029_p0 }
  0x98   : > { %p2035_p2 = pnand %p2033_p3, %p2030_p1 }
  0x9a   : > { %2038 = shalt.err (!%p2035_p2)
}
  0x9b   : > { %s2039_s30 = scalar_lea.vmem %s471_s17, 1024  ;;  %p2047_p4 = scmp.lt.s32.totalorder %s471_s17, %s471_s17 }
  0x9c   : > { %p2040_p5 = scmp.ne.s32.totalorder %s471_s17, %s2039_s30  ;;  %p2048_p10 = scmp.lt.s32.totalorder %s2039_s30, %s2039_s30 }
  0x9e   : > { %p2042_p7 = pnand %p2040_p5, %p2378_p8  ;;  %p2049_p11 = por %p2048_p10, %p2047_p4 }
  0xa0   : > { %p2043_p9 = pneg %p2042_p7 }
  0xa2   : > { %p2050_p12 = pnand %p2049_p11, %p2043_p9 }
  0xa4   : > { %2053 = shalt.err (!%p2050_p12)
}
  0xa5   : > { %s2901_s13 = smov 64   ;;  %s2237_s16 = smov [#allocation14]  }
  0xa6   : > { %1792 = dma.hbm_to_vmem [thread:$0]  (!%p2362_p6), %s2900_s11, 1024, %s471_s17, [#allocation12], %s2901_s13, %s2901_s13, %s2234_s2  }
  0xa7   : > { %s484_s15 = sshll.u32 %s2237_s16, 4  ;;  %s2054_s14 = scalar_lea.hbm %s2869_s12, 16  ;;  %s485_s15 = int_to_ptr.vmem [resolvable:$true] %s484_s15 }
  0xa8   : > { %p2055_p13 = scmp.ne.s32.totalorder %s2869_s12, %s2054_s14  ;;  %p2061_p3 = scmp.lt.u32.totalorder %s2054_s14, %s2869_s12 }
  0xaa   : > { %p2057_p0 = pnand %p2055_p13, %p2378_p8 }
  0xac   : > { %p2058_p1 = pneg %p2057_p0 }
  0xae   : > { %p2063_p2 = pnand %p2061_p3, %p2058_p1 }
  0xb0   : > { %2066 = shalt.err (!%p2063_p2)
}
  0xb1   : > { %s2067_s2 = scalar_lea.vmem %s485_s15, 16  ;;  %s2074_s17 = scalar_lea.vmem %s485_s15, 32 }
  0xb2   : > { %p2068_p5 = scmp.ne.s32.totalorder %s485_s15, %s2067_s2  ;;  %p2075_p4 = scmp.lt.s32.totalorder %s485_s15, %s485_s15 }
  0xb3   : > { %p2076_p10 = scmp.lt.s32.totalorder %s2074_s17, %s2067_s2 }
  0xb4   : > { %p2070_p7 = pnand %p2068_p5, %p2378_p8 }
  0xb5   : > { %p2077_p11 = por %p2076_p10, %p2075_p4 }
  0xb6   : > { %p2071_p9 = pneg %p2070_p7 }
  0xb8   : > { %p2078_p12 = pnand %p2077_p11, %p2071_p9 }
  0xba   : > { %2081 = shalt.err (!%p2078_p12)
}
  0xbb   : > { %1795 = dma.hbm_to_vmem [thread:$0]  (!%p2362_p6), %s2869_s12, 16, %s485_s15, [#allocation15]  }
  0xbc   : > { %s1504_s26 = sadd.s32 4294967294, %s2228_s21   ;;  %s2511_s28 = sadd.s32 1, %s2228_s21  }
  0xbd   : > { %s41_s9 = ssub.s32 %s2228_s21, %s2511_s28  ;;  %s44_s16 = sadd.s32 1, %s2224_s20 }
  0xbe   : > { %p42_p8 = scmp.eq.s32.totalorder %s41_s9, 0  ;;  %p51_p13 = scmp.ne.s32.totalorder %s2224_s20, %s2220_s19 }
  0xbf   : > { %p52_p0 = scmp.eq.s32.totalorder %s2228_s21, 0  ;;  %p57_p1 = scmp.ne.s32.totalorder %s2220_s19, %s2216_s18 }
  0xc0   : > { %s2522_s22 = scalar_select %p42_p8, %s2224_s20, %s44_s16  }
  0xc1   : > { %p2524_p3 = por %p52_p0, %p51_p13  ;;  %p2903_p2 = scmp.eq.s32.totalorder %s2346_s24, 0 }
  0xc2   : > { %p385_p5 = scmp.eq.s32.totalorder %s2346_s24, 1  ;;  %p391_p7 = scmp.eq.s32.totalorder %s1504_s26, 1 }
  0xc3   : > { %p2530_p6 = por %p2903_p2, %p57_p1  ;;  %p1813_p9 = scmp.lt.s32.totalorder %s2228_s21, 2 }
  0xc4   : > { %s501_s14 = sand.u32 1, %s2224_s20   ;;  %p2537_p4 = por %p385_p5, %p51_p13 }
  0xc5   : > { %s2904_s15 = scalar_select %p2530_p6, 1, 0 }
  0xc6   : > { %s2905_s27 = scalar_select %p2537_p4, 1, 0 }
  0xc7   : > { %p2541_p10 = por %p391_p7, %p57_p1  ;;  %s2545_s4 = sshll.u32 %s501_s14, 3 }
  0xc8   : > { %s1514_s30 = sshll.u32 %s2228_s21, 7  ;;  %s505_s6 = scalar_lea.vmem [#allocation2], %s2545_s4 }
  0xc9   : > { %s2906_s23 = scalar_select %p2541_p10, 1, 0 }
  0xca   : > { %s2551_s13 = scalar_lea.hbm %s2857_s0, %s1514_s30  ;;  %s512_s26 = sshll.u32 %s505_s6, 4  ;;  %s2554_s26 = int_to_ptr.vmem [resolvable:$true] %s512_s26 }
  0xcb   : > { %p2558_p11 = pnand %p1813_p9, %p2524_p3  ;;  %s2565_s2 = scalar_lea.hbm %s2858_s1, %s1514_s30 }
  0xcc   : > { %s519_s17 = sand.u32 1, %s2228_s21   ;;  %s502_s7 = scalar_lea.sflag [#allocation3], %s501_s14 }
  0xcd   : > { %s2082_s8 = scalar_lea.hbm %s2551_s13, 128  ;;  %p2084_p8 = pneg %p2558_p11 }
  0xce   : > { %p2083_p12 = scmp.ne.s32.totalorder %s2551_s13, %s2082_s8  ;;  %s2087_s10 = scalar_lea.hbm %s2857_s0, 256 }
  0xcf   : > { %p2088_p1 = scmp.lt.u32.totalorder %s2551_s13, %s2857_s0  ;;  %p2089_p3 = scmp.lt.u32.totalorder %s2087_s10, %s2082_s8 }
  0xd0   : > { %p2085_p13 = pnand %p2084_p8, %p2083_p12  ;;  %p2091_p5 = scmp.lt.u32.totalorder %s2082_s8, %s2551_s13 }
  0xd1   : > { %p2090_p2 = por %p2089_p3, %p2088_p1 }
  0xd2   : > { %p2086_p0 = pneg %p2085_p13 }
  0xd3   : > { %p2092_p7 = por %p2091_p5, %p2090_p2 }
  0xd5   : > { %p2093_p9 = pnand %p2092_p7, %p2086_p0 }
  0xd7   : > { %2096 = shalt.err (!%p2093_p9)
}
  0xd8   : > { %s2097_s14 = scalar_lea.vmem %s2554_s26, 128  ;;  %s2238_s30 = smov [#allocation2]  }
  0xd9   : > { %p2098_p12 = scmp.ne.s32.totalorder %s2554_s26, %s2097_s14  ;;  %s2102_s16 = sshll.u32 %s2238_s30, 4  ;;  %s2103_s16 = int_to_ptr.vmem [resolvable:$false] %s2102_s16 }
  0xda   : > { %s2104_s11 = scalar_lea.vmem %s2103_s16, 256  ;;  %p2105_p4 = scmp.lt.s32.totalorder %s2554_s26, %s2103_s16 }
  0xdb   : > { %p2100_p13 = pnand %p2098_p12, %p2084_p8  ;;  %p2106_p1 = scmp.lt.s32.totalorder %s2104_s11, %s2097_s14 }
  0xdd   : > { %p2101_p10 = pneg %p2100_p13  ;;  %p2107_p3 = por %p2106_p1, %p2105_p4 }
  0xdf   : > { %p2108_p2 = pnand %p2107_p3, %p2101_p10 }
  0xe1   : > { %2111 = shalt.err (!%p2108_p2)
}
  0xe2   : > { %1799 = dma.hbm_to_vmem [thread:$0]  (!%p2558_p11), %s2551_s13, 128, %s2554_s26, %s502_s7  }
  0xe3   : > { %s523_s8 = scalar_lea.vmem [#allocation5], %s2545_s4  ;;  %s520_s29 = scalar_lea.sflag [#allocation6], %s519_s17 }
  0xe4   : > { %s530_s10 = sshll.u32 %s523_s8, 4  ;;  %s2112_s6 = scalar_lea.hbm %s2565_s2, 128  ;;  %s531_s10 = int_to_ptr.vmem [resolvable:$true] %s530_s10 }
  0xe5   : > { %p2113_p4 = scmp.ne.s32.totalorder %s2565_s2, %s2112_s6  ;;  %s2117_s30 = scalar_lea.hbm %s2858_s1, 256 }
  0xe6   : > { %p2118_p5 = scmp.lt.u32.totalorder %s2565_s2, %s2858_s1  ;;  %p2119_p7 = scmp.lt.u32.totalorder %s2117_s30, %s2112_s6 }
  0xe7   : > { %p2115_p10 = pnand %p2113_p4, %p2084_p8  ;;  %p2121_p12 = scmp.lt.u32.totalorder %s2112_s6, %s2565_s2 }
  0xe8   : > { %p2120_p9 = por %p2119_p7, %p2118_p5 }
  0xe9   : > { %p2116_p0 = pneg %p2115_p10 }
  0xea   : > { %p2122_p13 = por %p2121_p12, %p2120_p9 }
  0xec   : > { %p2123_p1 = pnand %p2122_p13, %p2116_p0 }
  0xee   : > { %2126 = shalt.err (!%p2123_p1)
}
  0xef   : > { %s2127_s7 = scalar_lea.vmem %s531_s10, 128  ;;  %s2239_s4 = smov [#allocation5]  }
  0xf0   : > { %p2128_p3 = scmp.ne.s32.totalorder %s531_s10, %s2127_s7  ;;  %s2132_s13 = sshll.u32 %s2239_s4, 4  ;;  %s2133_s13 = int_to_ptr.vmem [resolvable:$false] %s2132_s13 }
  0xf1   : > { %s2134_s26 = scalar_lea.vmem %s2133_s13, 256  ;;  %p2135_p10 = scmp.lt.s32.totalorder %s531_s10, %s2133_s13 }
  0xf2   : > { %p2130_p2 = pnand %p2128_p3, %p2084_p8  ;;  %p2136_p6 = scmp.lt.s32.totalorder %s2134_s26, %s2127_s7 }
  0xf4   : > { %p2131_p4 = pneg %p2130_p2  ;;  %p2137_p5 = por %p2136_p6, %p2135_p10 }
  0xf6   : > { %p2138_p7 = pnand %p2137_p5, %p2131_p4 }
  0xf8   : > { %2141 = shalt.err (!%p2138_p7)
}
  0xf9   : > { %1802 = dma.hbm_to_vmem [thread:$0]  (!%p2558_p11), %s2565_s2, 128, %s531_s10, %s520_s29  }
  0xfa   : > { %p2908_p0 = scmp.ne.s32.totalorder %s2893_s25, 0 }
  0xfb   : > { %s2618_s17 = sand.u32 (!%p2908_p0), 1, %s2220_s19   ;;  %p2909_p6 = scmp.ne.s32.totalorder (!%p2908_p0), %s2904_s15, 0 }
  0xfc   : > { %546 = sbr.rel (%p2908_p0) target bundleno = 1753 (0x6d9), region = 80  ;;  %s2621_s8 = sshll.u32 (!%p2908_p0), %s2618_s17, 3 }
  0xfd   : > { %s549_s6 = scalar_lea.sflag (!%p2908_p0), [#allocation3], %s2618_s17  ;;  %s552_s3 = scalar_lea.vmem (!%p2908_p0), [#allocation2], %s2621_s8 }
 0x103   : > { %2187 = dma.done.wait (%p2909_p6), %s549_s6, 128  }
 0x104   : > { %2189 = vsyncadd (%p2909_p6), %s549_s6, 4294967168  ;;  %s557_s25 = sand.u32 1, %s2346_s24   ;;  %s561_s2 = scalar_lea.vmem [#allocation5], %s2621_s8 }
 0x105   : > { %s558_s9 = scalar_lea.sflag [#allocation6], %s557_s25 }
 0x106   : > { %2191 = dma.done.wait (%p2909_p6), %s558_s9, 128  }
 0x107   : > { %2193 = vsyncadd (%p2909_p6), %s558_s9, 4294967168  ;;  %p2910_p11 = scmp.eq.s32.totalorder %s2346_s24, 0 }
 0x109   : > { %2195 = dma.done.wait (%p2910_p11), [#allocation6], 512   ;;  %p2911_p8 = pmov %p2910_p11 }
 0x10b   : > { %2197 = vsyncadd (%p2911_p8), [#allocation6], 4294966784  ;;  %p2912_p9 = pmov %p2911_p8 }
 0x10c   : > { %p2913_p12 = pmov %p2911_p8 }
 0x10d   : > { %2199 = dma.done.wait (%p2912_p9), [#allocation9], 1040  }
 0x10e   : > { %2201 = vsyncadd (%p2913_p12), [#allocation9], 4294966256  ;;  %p2914_p13 = pmov %p2911_p8 }
 0x10f   : > { %p2915_p1 = pmov %p2911_p8 }
 0x110   : > { %2203 = dma.done.wait (%p2914_p13), [#allocation12], 1040  }
 0x111   : > { %2205 = vsyncadd (%p2915_p1), [#allocation12], 4294966256  ;;  %p2916_p3 = pmov %p2915_p1 }
 0x112   : > { %p2917_p2 = pmov %p2915_p1 }
 0x113   : > { %2207 = dma.done.wait (%p2916_p3), [#allocation15], 16  }
 0x114   : > { %2209 = vsyncadd (%p2917_p2), [#allocation15], 4294967280  ;;  %v2240_v0 = vmov 0.0   ;;  %vm2241_vm0 = vmmov 0   ;;  %v2657_v1 = vld [vmem:[%s561_s2] sm:$0xff]  ;;  %v1866_v3 = vld [vmem:[#allocation7] sm:$0xff]  }
 0x115   : > { %1635 = vmatprep.subr.bf16.mxu0 %v2240_v0  ;;  %1643 = vmatprep.mubr.msk.bf16.mxu0 %vm2241_vm0, %v2240_v0  ;;  %v649_v2 = vpack.c.bf16 %v2657_v1, %v2657_v1  ;;  %s2242_s15 = smov 32   ;;  %v1867_v4 = vld [vmem:[#allocation7 + $0x8] sm:$0xff]   ;;  %v1870_v5 = vld [vmem:[%s2862_s5] sm:$0xff]   ;;  %v1868_v6 = vld [vmem:[#allocation7 + $0x10] sm:$0xff]   ;;  %vm653_vm1 = vcmask 261120   ;;  %vm696_vm2 = vcmask 523264  }
 0x116   : > { %1647 = vmatprep.subr.bf16.mxu1 %v2240_v0  ;;  %1663 = vmatprep.mubr.msk.bf16.mxu1 %vm2241_vm0, %v2240_v0  ;;  %v1871_v7 = vld [vmem:[%s2862_s5 + $0x8] sm:$0xff]   ;;  %v1869_v8 = vld [vmem:[#allocation7 + $0x18] sm:$0xff]   ;;  %v1872_v9 = vld [vmem:[%s2862_s5 + $0x10] sm:$0xff]   ;;  %s2918_s14 = sld [smem:[#allocation26_spill]]  ;;  %s2919_s11 = sld [smem:[#allocation30_spill]] }
 0x117   : > { %651 = vrot.lane.b32.xlu0 %v649_v2, %s2242_s15  ;;  %1636 = vmatpush3.bf16.msra.mxu0 %v1866_v3  ;;  %v1873_v10 = vld [vmem:[%s2862_s5 + $0x18] sm:$0xff]   ;;  %v1874_v11 = vld [vmem:[%s2862_s5 + $0x20] sm:$0xff]   ;;  %v1875_v12 = vld [vmem:[%s2862_s5 + $0x28] sm:$0xff]   ;;  %s2920_s13 = sld [smem:[#allocation27_spill]]  ;;  %s2921_s6 = sld [smem:[#allocation33_spill]] }
 0x118   : > { %1637 = vmatprep.subr.bf16.mxu0 %v2240_v0  ;;  %1648 = vmatpush3.bf16.msra.mxu1 %v1870_v5  ;;  %v1876_v13 = vld [vmem:[%s2862_s5 + $0x30] sm:$0xff]   ;;  %v647_v14 = vld [vmem:[%s552_s3] sm:$0xff]  ;;  %v1877_v18 = vld [vmem:[%s2862_s5 + $0x38] sm:$0xff]   ;;  %p641_p4 = scmp.lt.s32.totalorder %s2346_s24, 1  ;;  %s2922_s10 = sld [smem:[#allocation24_spill]] }
 0x119   : > { %1649 = vmatprep.subr.bf16.mxu1 %v2240_v0  ;;  %v648_v15 = vpack.c.bf16 %v647_v14, %v647_v14  ;;  %v1878_v19 = vld [vmem:[#allocation8] sm:$0xff]   ;;  %v1879_v20 = vld [vmem:[#allocation8 + $0x8] sm:$0xff]   ;;  %v1880_v21 = vld [vmem:[#allocation8 + $0x10] sm:$0xff]   ;;  %s2923_s30 = sld [smem:[#allocation34_spill]]  ;;  %s1582_s16 = sshll.u32 %s2346_s24, 7 }
 0x11a   : > { %v1881_v22 = vld [vmem:[#allocation8 + $0x18] sm:$0xff]   ;;  %v1882_v23 = vld [vmem:[#allocation8 + $0x20] sm:$0xff]   ;;  %v1883_v24 = vld [vmem:[#allocation8 + $0x28] sm:$0xff]   ;;  %s642_s25 = scalar_select %p641_p4, %s2346_s24, 1 }
 0x11b   : > { %1638 = vmatpush3.bf16.msra.mxu0 %v1867_v4  ;;  %v1884_v25 = vld [vmem:[#allocation8 + $0x30] sm:$0xff]   ;;  %v1885_v33 = vld [vmem:[#allocation8 + $0x38] sm:$0xff]   ;;  %v1894_v49 = vld [vmem:[#allocation13] sm:$0xff]   ;;  %s640_s7 = scalar_lea.vmem [#allocation16], %s2621_s8  ;;  %s1329_s2 = scalar_lea.sflag [#allocation4], %s2618_s17 }
 0x11c   : > { %1639 = vmatprep.subr.bf16.mxu0 %v2240_v0  ;;  %1650 = vmatpush3.bf16.msra.mxu1 %v1871_v7  ;;  %v1528_v26 = vld [vmem:[%s2918_s14] ss:$0 sm:$0xff]  ;;  %v1887_v42 = vld [vmem:[%s2919_s11 + $0x8] sm:$0xff]   ;;  %v1888_v43 = vld [vmem:[%s2919_s11 + $0x10] sm:$0xff]   ;;  %s1527_s9 = sshll.u32 %s642_s25, 3  ;;  %s1342_s4 = sshll.u32 %s640_s7, 4  ;;  %s2814_s4 = int_to_ptr.vmem [resolvable:$true] %s1342_s4 }
 0x11d   : > { %1651 = vmatprep.subr.bf16.mxu1 %v2240_v0  ;;  %v1886_v34 = vld [vmem:[%s2919_s11] sm:$0xff]   ;;  %v1889_v44 = vld [vmem:[%s2919_s11 + $0x18] sm:$0xff]   ;;  %v1891_v46 = vld [vmem:[%s2919_s11 + $0x28] sm:$0xff]   ;;  %s2924_s25 = sld [smem:[#allocation35_spill]]  ;;  %s2142_s15 = scalar_lea.vmem %s2814_s4, 128 }
 0x11e   : > { %v1534_v35 = vld [vmem:[%s2920_s13] ss:$0 sm:$0xff]  ;;  %v1892_v47 = vld [vmem:[%s2919_s11 + $0x30] sm:$0xff]   ;;  %v1893_v48 = vld [vmem:[%s2919_s11 + $0x38] sm:$0xff]   ;;  %s644_s3 = scalar_lea.vmem %s2922_s10, %s1527_s9  ;;  %p2143_p10 = scmp.ne.s32.totalorder %s2814_s4, %s2142_s15 }
 0x11f   : > { %1640 = vmatpush3.bf16.msra.mxu0 %v1868_v6  ;;  %v1890_v45 = vld [vmem:[%s2919_s11 + $0x20] sm:$0xff]   ;;  %v1895_v50 = vld [vmem:[#allocation13 + $0x8] sm:$0xff]   ;;  %v1896_v51 = vld [vmem:[#allocation13 + $0x10] sm:$0xff]   ;;  %p2925_p5 = scmp.ne.s32.totalorder %s2905_s27, 0  ;;  %s2244_s24 = smov [#allocation16]  }
 0x120   : > { %1641 = vmatprep.subr.bf16.mxu0 %v2240_v0  ;;  %1652 = vmatpush3.bf16.msra.mxu1 %v1872_v9  ;;  %v1897_v52 = vld [vmem:[#allocation13 + $0x18] sm:$0xff]   ;;  %v1898_v53 = vld [vmem:[#allocation13 + $0x20] sm:$0xff]   ;;  %v1899_v54 = vld [vmem:[#allocation13 + $0x28] sm:$0xff]   ;;  %s2146_s8 = sshll.u32 %s2244_s24, 4  ;;  %s2147_s8 = int_to_ptr.vmem [resolvable:$false] %s2146_s8 }
 0x121   : > { %1653 = vmatprep.subr.bf16.mxu1 %v2240_v0  ;;  %v1900_v55 = vld [vmem:[#allocation13 + $0x30] sm:$0xff]   ;;  %v1543_v56 = vld [vmem:[#allocation10] ss:$0 sm:$0xff]  ;;  %p2144_p7 = pnand %p2143_p10, %p2925_p5  ;;  %s2148_s10 = scalar_lea.vmem %s2147_s8, 256 }
 0x122   : > { %v1902_v9 = vld [vmem:[%s2921_s6] sm:$0xff]   ;;  %p2149_p6 = scmp.lt.s32.totalorder %s2814_s4, %s2147_s8  ;;  %p2150_p11 = scmp.lt.s32.totalorder %s2148_s10, %s2142_s15 }
 0x123   : > { %1642 = vmatpush3.bf16.msra.mxu0 %v1869_v8  ;;  %v1901_v8 = vld [vmem:[#allocation13 + $0x38] sm:$0xff]   ;;  %s2812_s9 = scalar_lea.hbm %s2924_s25, %s1582_s16  ;;  %p2145_p0 = pneg %p2144_p7 }
 0x124   : > { %1667 = vmatprep.subr.bf16.mxu0 %v2240_v0  ;;  %1654 = vmatpush3.bf16.msra.mxu1 %v1873_v10  ;;  %v1553_v10 = vld [vmem:[#allocation11] ss:$0 sm:$0xff]  ;;  %p2151_p8 = por %p2150_p11, %p2149_p6 }
 0x125   : > { %1655 = vmatprep.subr.bf16.mxu1 %v2240_v0 }
 0x126   : > { %p2152_p9 = pnand %p2151_p8, %p2145_p0 }
 0x128   : > { %1656 = vmatpush3.bf16.msra.mxu1 %v1874_v11 }
 0x129   : > { %1657 = vmatprep.subr.bf16.mxu1 %v2240_v0 }
 0x12c   : > { %1658 = vmatpush3.bf16.msra.mxu1 %v1875_v12 }
 0x12d   : > { %1659 = vmatprep.subr.bf16.mxu1 %v2240_v0 }
 0x130   : > { %1660 = vmatpush3.bf16.msra.mxu1 %v1876_v13 }
 0x131   : > { %1661 = vmatprep.subr.bf16.mxu1 %v2240_v0 }
 0x134   : > { %1662 = vmatpush3.bf16.msra.mxu1 %v1877_v18  ;;  %v1904_v18 = vld [vmem:[%s2921_s6 + $0x10] sm:$0xff]  }
 0x135   : > { %1687 = vmatprep.subr.bf16.mxu1 %v2240_v0 }
 0x189   : > { %v652_v16 = vpop.permute.xlu0 %651 }
 0x18a   : > { %v656_v17 = vsel %vm653_vm1, %v648_v15, %v652_v16 }
 0x18b   : > { %1644 = vmatmul.mubr.msk.bf16.vlgmr.msra.gmra.mrb[0].mxu0 %vm696_vm2, %v656_v17  ;;  %v1903_v17 = vld [vmem:[%s2921_s6 + $0x8] sm:$0xff]  }
 0x18c   : > { %1683 = vmatprep.mubr.msk.bf16.mxu0 %vm2241_vm0, %v2240_v0  ;;  %1668 = vmatpush3.bf16.msra.mxu0 %v1878_v19  ;;  %v1905_v19 = vld [vmem:[%s2921_s6 + $0x18] sm:$0xff]  }
 0x18d   : > { %1669 = vmatprep.subr.bf16.mxu0 %v2240_v0 }
 0x190   : > { %1670 = vmatpush3.bf16.msra.mxu0 %v1879_v20  ;;  %v1906_v20 = vld [vmem:[%s2921_s6 + $0x20] sm:$0xff]  }
 0x191   : > { %1671 = vmatprep.subr.bf16.mxu0 %v2240_v0 }
 0x194   : > { %1672 = vmatpush3.bf16.msra.mxu0 %v1880_v21  ;;  %v1907_v21 = vld [vmem:[%s2921_s6 + $0x28] sm:$0xff]  }
 0x195   : > { %1673 = vmatprep.subr.bf16.mxu0 %v2240_v0 }
 0x198   : > { %1674 = vmatpush3.bf16.msra.mxu0 %v1881_v22  ;;  %v1908_v22 = vld [vmem:[%s2921_s6 + $0x30] sm:$0xff]  }
 0x199   : > { %1675 = vmatprep.subr.bf16.mxu0 %v2240_v0 }
 0x19c   : > { %1676 = vmatpush3.bf16.msra.mxu0 %v1882_v23  ;;  %v1909_v23 = vld [vmem:[%s2921_s6 + $0x38] sm:$0xff]  }
 0x19d   : > { %1677 = vmatprep.subr.bf16.mxu0 %v2240_v0 }
 0x1a0   : > { %1678 = vmatpush3.bf16.msra.mxu0 %v1883_v24  ;;  %v2243_v24 = vmov 0  }
 0x1a1   : > { %1679 = vmatprep.subr.bf16.mxu0 %v2240_v0  ;;  %1865 = vset.pattern.permute.xlu0 %v2243_v24 }
 0x1a4   : > { %1680 = vmatpush3.bf16.msra.mxu0 %v1884_v25  ;;  %v1320_v25 = vld [vmem:[%s644_s3] sm:$0xff] }
 0x1a5   : > { %1681 = vmatprep.subr.bf16.mxu0 %v2240_v0  ;;  %1323 = vperm.xlu0 %1865, %v1320_v25  }
 0x1a8   : > { %1682 = vmatpush3.bf16.msra.mxu0 %v1885_v33 }
 0x1a9   : > { %1707 = vmatprep.subr.bf16.mxu0 %v2240_v0 }
 0x25e   : > { %v733_v27 = vpop.f32.mrb[0].mxu0 }
 0x25f   : > { %v2712_v28 = vadd.f32 %v1528_v26, %v733_v27  ;;  %v1645_v29 = vpop.f32.mrb[1].mxu0  ;;  %v1562_v26 = vld [vmem:[#allocation14] ss:$0 sm:$0xff] }
 0x260   : > { %v736_v30 = vpop.f32.mrb[2].mxu0 }
 0x261   : > { %v739_v31 = vpack.c.bf16 %v2712_v28, %v2712_v28  ;;  %v1646_v32 = vpop.f32.mrb[3].mxu0 }
 0x263   : > { %1664 = vmatmul.mubr.bf16.vlgmr.msra.gmra.mrb[0].mxu1 %v739_v31 }
 0x264   : > { %1703 = vmatprep.mubr.msk.bf16.mxu1 %vm2241_vm0, %v2240_v0  ;;  %1688 = vmatpush3.bf16.msra.mxu1 %v1886_v34 }
 0x265   : > { %1689 = vmatprep.subr.bf16.mxu1 %v2240_v0 }
 0x268   : > { %1690 = vmatpush3.bf16.msra.mxu1 %v1887_v42 }
 0x269   : > { %1691 = vmatprep.subr.bf16.mxu1 %v2240_v0 }
 0x26c   : > { %1692 = vmatpush3.bf16.msra.mxu1 %v1888_v43 }
 0x26d   : > { %1693 = vmatprep.subr.bf16.mxu1 %v2240_v0 }
 0x270   : > { %1694 = vmatpush3.bf16.msra.mxu1 %v1889_v44 }
 0x271   : > { %1695 = vmatprep.subr.bf16.mxu1 %v2240_v0 }
 0x274   : > { %1696 = vmatpush3.bf16.msra.mxu1 %v1890_v45 }
 0x275   : > { %1697 = vmatprep.subr.bf16.mxu1 %v2240_v0 }
 0x278   : > { %1698 = vmatpush3.bf16.msra.mxu1 %v1891_v46  ;;  %v1324_v46 = vpop.permute.xlu0 %1323 }
 0x279   : > { %1699 = vmatprep.subr.bf16.mxu1 %v2240_v0 }
 0x27c   : > { %1700 = vmatpush3.bf16.msra.mxu1 %v1892_v47 }
 0x27d   : > { %1701 = vmatprep.subr.bf16.mxu1 %v2240_v0 }
 0x280   : > { %1702 = vmatpush3.bf16.msra.mxu1 %v1893_v48 }
 0x281   : > { %1727 = vmatprep.subr.bf16.mxu1 %v2240_v0 }
 0x336   : > { %v845_v36 = vpop.f32.mrb[0].mxu1 }
 0x337   : > { %v846_v37 = vadd.f32 %v1534_v35, %v845_v36  ;;  %v1665_v38 = vpop.f32.mrb[1].mxu1 }
 0x338   : > { %v848_v39 = vpop.f32.mrb[2].mxu1 }
 0x339   : > { %v851_v40 = vpack.c.bf16 %v846_v37, %v846_v37  ;;  %v1666_v41 = vpop.f32.mrb[3].mxu1  ;;  %v1317_v39 = vmul.f32 %v2657_v1, %v2657_v1 }
 0x33b   : > { %1684 = vmatmul.mubr.bf16.vlgmr.msra.gmra.mrb[4].mxu0 %v851_v40  ;;  %v1572_v40 = vld [vmem:[%s2923_s30] ss:$0 sm:$0xff]  ;;  %v1318_v41 = vmul.f32 0.5, %v1317_v39 }
 0x33c   : > { %1723 = vmatprep.mubr.msk.bf16.mxu0 %vm2241_vm0, %v2240_v0  ;;  %1708 = vmatpush3.bf16.msra.mxu0 %v1894_v49 }
 0x33d   : > { %1709 = vmatprep.subr.bf16.mxu0 %v2240_v0 }
 0x340   : > { %1710 = vmatpush3.bf16.msra.mxu0 %v1895_v50 }
 0x341   : > { %1711 = vmatprep.subr.bf16.mxu0 %v2240_v0 }
 0x344   : > { %1712 = vmatpush3.bf16.msra.mxu0 %v1896_v51 }
 0x345   : > { %1713 = vmatprep.subr.bf16.mxu0 %v2240_v0 }
 0x348   : > { %1714 = vmatpush3.bf16.msra.mxu0 %v1897_v52 }
 0x349   : > { %1715 = vmatprep.subr.bf16.mxu0 %v2240_v0 }
 0x34c   : > { %1716 = vmatpush3.bf16.msra.mxu0 %v1898_v53 }
 0x34d   : > { %1717 = vmatprep.subr.bf16.mxu0 %v2240_v0 }
 0x350   : > { %1718 = vmatpush3.bf16.msra.mxu0 %v1899_v54 }
 0x351   : > { %1719 = vmatprep.subr.bf16.mxu0 %v2240_v0 }
 0x354   : > { %1720 = vmatpush3.bf16.msra.mxu0 %v1900_v55 }
 0x355   : > { %1721 = vmatprep.subr.bf16.mxu0 %v2240_v0 }
 0x358   : > { %1722 = vmatpush3.bf16.msra.mxu0 %v1901_v8 }
 0x40e   : > { %v957_v57 = vpop.f32.mrb[4].mxu0 }
 0x40f   : > { %v958_v58 = vadd.f32 %v1543_v56, %v957_v57  ;;  %v1685_v59 = vpop.f32.mrb[5].mxu0 }
 0x410   : > { %v960_v60 = vpop.f32.mrb[6].mxu0 }
 0x411   : > { %v963_v61 = vadd.f32 %v958_v58, %v2712_v28  ;;  %v1686_v62 = vpop.f32.mrb[7].mxu0 }
 0x413   : > { %v964_v63 = vpack.c.bf16 %v963_v61, %v963_v61  ;;  %vm969_vm3 = vcmp.gt.f32.partialorder %v963_v61, 0.0 }
 0x415   : > { %v966_v2 = vmul.bf16 1069105081, %v964_v63 }
 0x417   : > { %1910 = vpow.bf16 %v966_v2 }
 0x422   : > { %v1911_v3 = vpop.eup %1910 }
 0x423   : > { %v968_v4 = vunpack.c.l.bf16 %v1911_v3 }
 0x425   : > { %v1552_v5 = vadd.f32 -1.0, %v968_v4 }
 0x427   : > { %v971_v6 = vsel %vm969_vm3, %v963_v61, %v1552_v5 }
 0x428   : > { %v972_v7 = vpack.c.bf16 %v971_v6, %v971_v6 }
 0x42a   : > { %1704 = vmatmul.mubr.bf16.vlgmr.msra.gmra.mrb[4].mxu1 %v972_v7 }
 0x42b   : > { %1743 = vmatprep.mubr.msk.bf16.mxu1 %vm2241_vm0, %v2240_v0  ;;  %1728 = vmatpush3.bf16.msra.mxu1 %v1902_v9 }
 0x42c   : > { %1729 = vmatprep.subr.bf16.mxu1 %v2240_v0 }
 0x42f   : > { %1730 = vmatpush3.bf16.msra.mxu1 %v1903_v17 }
 0x430   : > { %1731 = vmatprep.subr.bf16.mxu1 %v2240_v0 }
 0x433   : > { %1732 = vmatpush3.bf16.msra.mxu1 %v1904_v18 }
 0x434   : > { %1733 = vmatprep.subr.bf16.mxu1 %v2240_v0 }
 0x437   : > { %1734 = vmatpush3.bf16.msra.mxu1 %v1905_v19 }
 0x438   : > { %1735 = vmatprep.subr.bf16.mxu1 %v2240_v0 }
 0x43b   : > { %1736 = vmatpush3.bf16.msra.mxu1 %v1906_v20 }
 0x43c   : > { %1737 = vmatprep.subr.bf16.mxu1 %v2240_v0 }
 0x43f   : > { %1738 = vmatpush3.bf16.msra.mxu1 %v1907_v21 }
 0x440   : > { %1739 = vmatprep.subr.bf16.mxu1 %v2240_v0 }
 0x443   : > { %1740 = vmatpush3.bf16.msra.mxu1 %v1908_v22 }
 0x444   : > { %1741 = vmatprep.subr.bf16.mxu1 %v2240_v0 }
 0x447   : > { %1742 = vmatpush3.bf16.msra.mxu1 %v1909_v23 }
 0x4fd   : > { %v1078_v11 = vpop.f32.mrb[4].mxu1 }
 0x4fe   : > { %v1079_v12 = vadd.f32 %v1553_v10, %v1078_v11  ;;  %v1705_v13 = vpop.f32.mrb[5].mxu1 }
 0x4ff   : > { %v1081_v14 = vpop.f32.mrb[6].mxu1 }
 0x500   : > { %v1084_v15 = vpack.c.bf16 %v1079_v12, %v1079_v12  ;;  %v1706_v16 = vpop.f32.mrb[7].mxu1 }
 0x502   : > { %1724 = vmatmul.mubr.bf16.vlgmr.msra.gmra.mrb[8].mxu0 %v1084_v15 }
 0x5d5   : > { %v1190_v27 = vpop.f32.mrb[8].mxu0 }
 0x5d6   : > { %v1191_v28 = vadd.f32 %v1562_v26, %v1190_v27  ;;  %v1725_v0 = vpop.f32.mrb[9].mxu0 }
 0x5d7   : > { %v1193_v29 = vpop.f32.mrb[10].mxu0 }
 0x5d8   : > { %v1196_v30 = vadd.f32 %v1191_v28, %v971_v6  ;;  %v1726_v31 = vpop.f32.mrb[11].mxu0 }
 0x5da   : > { %v1197_v32 = vpack.c.bf16 %v1196_v30, %v1196_v30  ;;  %vm1202_vm4 = vcmp.gt.f32.partialorder %v1196_v30, 0.0 }
 0x5dc   : > { %v1199_v33 = vmul.bf16 1069105081, %v1197_v32 }
 0x5de   : > { %1912 = vpow.bf16 %v1199_v33 }
 0x5e9   : > { %v1913_v34 = vpop.eup %1912 }
 0x5ea   : > { %v1201_v35 = vunpack.c.l.bf16 %v1913_v34 }
 0x5ec   : > { %v1571_v36 = vadd.f32 -1.0, %v1201_v35 }
 0x5ee   : > { %v1204_v37 = vsel %vm1202_vm4, %v1196_v30, %v1571_v36 }
 0x5ef   : > { %v1205_v38 = vpack.c.bf16 %v1204_v37, %v1204_v37 }
 0x5f1   : > { %1744 = vmatmul.mubr.bf16.vlgmr.msra.gmra.mrb[8].mxu1 %v1205_v38 }
 0x6c4   : > { %v1311_v42 = vpop.f32.mrb[8].mxu1 }
 0x6c5   : > { %v1312_v43 = vadd.f32 %v1572_v40, %v1311_v42  ;;  %v1745_v44 = vpop.f32.mrb[9].mxu1 }
 0x6c6   : > { %v1314_v45 = vpop.f32.mrb[10].mxu1 }
 0x6c7   : > { %v1746_v47 = vpop.f32.mrb[11].mxu1  ;;  %v1319_v48 = vadd.f32 %v1318_v41, %v1312_v43 }
 0x6c9   : > { %v1326_v49 = vmul.f32 %v1324_v46, %v1319_v48 }
 0x6cb   : > { %1327 = vst.msk [vmem:[%s640_s7] sm:$0xff] %vm653_vm1, %v1326_v49 }
 0x6cc   : > { %2155 = shalt.err (!%p2152_p9)
}
 0x6cd   : > { %s2156_s17 = scalar_lea.hbm %s2812_s9, 128  ;;  %s2160_s14 = scalar_lea.hbm %s2924_s25, 256 }
 0x6ce   : > { %p2157_p12 = scmp.ne.s32.totalorder %s2812_s9, %s2156_s17  ;;  %p2161_p3 = scmp.lt.u32.totalorder %s2812_s9, %s2924_s25 }
 0x6cf   : > { %p2162_p2 = scmp.lt.u32.totalorder %s2160_s14, %s2156_s17  ;;  %p2164_p10 = scmp.lt.u32.totalorder %s2156_s17, %s2812_s9 }
 0x6d0   : > { %p2158_p13 = pnand %p2157_p12, %p2925_p5 }
 0x6d1   : > { %p2163_p4 = por %p2162_p2, %p2161_p3 }
 0x6d2   : > { %p2159_p1 = pneg %p2158_p13 }
 0x6d3   : > { %p2165_p7 = por %p2164_p10, %p2163_p4 }
 0x6d5   : > { %p2166_p0 = pnand %p2165_p7, %p2159_p1 }
 0x6d7   : > { %2169 = shalt.err (!%p2166_p0)
}
 0x6d8   : > { %1775 = dma.vmem_to_hbm [thread:$0]  (%p2925_p5), %s2814_s4, 128, %s2812_s9, %s1329_s2  }
 0x6d9 PF: > { %s1354_s7 = sand.u32 1, %s2216_s18   ;;  %p2926_p6 = scmp.ne.s32.totalorder %s2906_s23, 0 }
 0x6da   : > { %p2927_p11 = scmp.ge.s32.totalorder %s2228_s21, 2  ;;  %s1355_s13 = scalar_lea.sflag [#allocation4], %s1354_s7 }
 0x6dc   : > { %p1804_p8 = pnand %p2927_p11, %p2926_p6 }
 0x6de   : > { %2211 = dma.done.wait (!%p1804_p8), %s1355_s13, 128  }
 0x6df   : > { %2213 = vsyncadd (!%p1804_p8), %s1355_s13, 4294967168  ;;  %p34_p9 = scmp.ge.s32.totalorder %s2511_s28, 4   ;;  %s2928_s18 = smov %s2220_s19 }
 0x6e0   : > { %s2929_s19 = smov %s2224_s20  ;;  %s2930_s20 = smov %s2522_s22 }
 0x6e1   : > { %s2931_s21 = smov %s2511_s28  ;;  %36 = sbr.rel (!%p34_p9) target bundleno = 23 (0x17), region = 165 }
 0x6e8   :  { %1360 = vsyncpa [#allocation3], 1 }
 0x6e9   :  { %1362 = vsyncpa [#allocation3 + $0x1], 1 }
 0x6ea   :  { %1363 = vsyncpa [#allocation6], 1 }
 0x6eb   :  { %1365 = vsyncpa [#allocation6 + $0x1], 1 }
 0x6ec   :  { %1366 = vsyncpa [#allocation9], 1 }
 0x6ed   :  { %1367 = vsyncpa [#allocation12], 1 }
 0x6ee   :  { %1368 = vsyncpa [#allocation15], 1 }
 0x6ef   :  { %1369 = vsyncpa [#allocation4], 1 }
 0x6f0   :  { %1371 = vsyncpa [#allocation4 + $0x1], 1 }

</bundles_post_ra>
